<compile_context>
chip_gen: v7x
topology: tpu7x:2x2x1
jax: 0.10.0
libtpu: 0.0.40
codegen_flags: <defaults>
</compile_context>

<pallas_src>
import math
import functools

import jax
import jax.numpy as jnp
from jax.experimental import pallas as pl
from jax.experimental.pallas import tpu as pltpu


def _round_up(v, m):
    return ((v + m - 1) // m) * m


def _pick_tiles(batch, depth, classes, c_tile, b_tile, w_bytes,
                budget=36 * 2**20):
    """Clamp tiles to the problem size and shrink them to fit a VMEM budget."""
    c_tile = max(128, _round_up(min(int(c_tile), _round_up(classes, 128)), 128))
    b_tile = max(8, _round_up(min(int(b_tile), _round_up(batch, 8)), 8))

    def est(bt, ct):
        return (2 * ct * depth * w_bytes          # double-buffered weight stream
                + 2 * bt * depth * w_bytes        # x block
                + 2 * bt * ct * 4                 # f32 cosine output block
                + 2 * ct * 4                      # inv_norm block
                + 4 * bt * 4                      # label + per-row loss blocks
                + 3 * _round_up(bt, 8) * 128 * 4)  # (bt,1) f32 scratch (lane-padded)

    while c_tile > 128 and est(b_tile, c_tile) > budget:
        c_tile = max(128, ((c_tile // 2) // 128) * 128)
    while b_tile > 8 and est(b_tile, c_tile) > budget:
        b_tile = max(8, ((b_tile // 2) // 8) * 8)
    return b_tile, c_tile


def _arc_margin_kernel(label_ref, x_ref, w_ref, inv_norm_ref,
                       cos_ref, loss_ref,
                       m_sc, l_sc, t_sc,
                       *, s, cos_m, sin_m, th, mm, easy_margin,
                       num_classes, c_tile, needs_mask):
    c = pl.program_id(1)          # class axis (innermost, "arbitrary" / reduction)

    @pl.when(c == 0)
    def _init():
        m_sc[...] = jnp.full_like(m_sc, -1e30)   # running max of s*cosine
        l_sc[...] = jnp.zeros_like(l_sc)         # running sum of exp(s*cos - max)
        t_sc[...] = jnp.zeros_like(t_sc)         # target-class cosine per row

    x = x_ref[...]                                # (b_tile, D)  compute dtype (bf16)
    w = w_ref[...]                                # (c_tile, D)  compute dtype (bf16)

    # MXU matmul contracting the shared last dim (A @ B^T); f32 accumulation.
    dot = jax.lax.dot_general(
        x, w, dimension_numbers=(((1,), (1,)), ((), ())),
        preferred_element_type=jnp.float32)       # (b_tile, c_tile) f32

    # Normalization hoisted to the wrapper: cosine = (x.w) / ||w||.
    cosine = dot * inv_norm_ref[...]              # (1, c_tile) broadcast
    # TODO(synk): optionally emit cosine in bf16 (or skip it) when only the loss
    # is consumed; kept f32 here to match the module's `.float()` output.
    cos_ref[...] = cosine.astype(cos_ref.dtype)

    # Accumulate the target-class cosine (one non-zero term over all class tiles).
    label = label_ref[...]                                          # (b_tile, 1) i32
    col = jax.lax.broadcasted_iota(jnp.int32, cosine.shape, 1) + c * c_tile
    is_target = col == label
    t_sc[...] = t_sc[...] + jnp.sum(jnp.where(is_target, cosine, 0.0),
                                    axis=1, keepdims=True)

    # Online logsumexp on s*cosine only (margin correction applied in finalize).
    logits = cosine * s
    if needs_mask:  # only emitted when C % c_tile != 0 (garbage columns possible)
        logits = jnp.where(col < num_classes, logits, -1e30)

    m_prev = m_sc[...]
    m_new = jnp.maximum(m_prev, jnp.max(logits, axis=1, keepdims=True))
    l_sc[...] = l_sc[...] * jnp.exp(m_prev - m_new) + jnp.sum(
        jnp.exp(logits - m_new), axis=1, keepdims=True)
    m_sc[...] = m_new

    @pl.when(c == pl.num_programs(1) - 1)
    def _finalize():
        # Margin math on the (b_tile, 1) target cosine only.
        cos_t = t_sc[...]
        sin_t = jnp.sqrt(jnp.clip(1.0 - cos_t * cos_t, 0.0, 1.0))
        phi_t = cos_t * cos_m - sin_t * sin_m
        if easy_margin:
            phi_t = jnp.where(cos_t > 0.0, phi_t, cos_t)
        else:
            phi_t = jnp.where(cos_t > th, phi_t, cos_t - mm)

        m_run = m_sc[...]
        # Swap the target term: remove exp(s*cos_t), add exp(s*phi_t).
        l_corr = l_sc[...] + jnp.exp(s * phi_t - m_run) - jnp.exp(s * cos_t - m_run)
        l_corr = jnp.maximum(l_corr, 1e-30)
        lse = m_run + jnp.log(l_corr)
        loss_ref[...] = lse - s * phi_t            # per-row CE; mean in wrapper


def arc_margin_forward(x, weight, label=None, *, s=10.0, m=0.5,
                       easy_margin=False, c_tile=1024, b_tile=256,
                       compute_dtype=jnp.bfloat16):
    """ArcMarginProduct.forward: (loss, cosine) if label is given, else cosine."""
    B, D = x.shape
    C, D2 = weight.shape
    assert D == D2

    w_bytes = jnp.dtype(compute_dtype).itemsize
    b_tile, c_tile = _pick_tiles(B, D, C, c_tile, b_tile, w_bytes)

    num_b = pl.cdiv(B, b_tile)
    num_c = pl.cdiv(C, c_tile)
    B_pad = num_b * b_tile
    C_pad = num_c * c_tile

    # Per-class reciprocal norm in f32 (matches F.normalize eps), padded to C_pad.
    w32 = weight.astype(jnp.float32)
    inv_norm = 1.0 / jnp.maximum(jnp.sqrt(jnp.sum(w32 * w32, axis=1)), 1e-12)
    inv_norm = jnp.zeros((1, C_pad), jnp.float32).at[0, :C].set(inv_norm)

    # MXU operands in compute_dtype; weight keeps its (C, D) layout (streamed
    # directly, no transpose / class-pad materialization).  In a real model the
    # parameter would be stored in bf16 so this cast is a no-op.
    x_c = x.astype(compute_dtype)
    w_c = weight if weight.dtype == compute_dtype else weight.astype(compute_dtype)

    if B_pad != B:
        x_c = jnp.zeros((B_pad, D), compute_dtype).at[:B].set(x_c)
    if label is None:
        label_arr = jnp.zeros((B_pad, 1), jnp.int32)
    else:
        lab = label.astype(jnp.int32).reshape(B, 1)
        label_arr = lab if B_pad == B else (
            jnp.zeros((B_pad, 1), jnp.int32).at[:B].set(lab))

    kernel = functools.partial(
        _arc_margin_kernel,
        s=float(s), cos_m=math.cos(m), sin_m=math.sin(m),
        th=math.cos(math.pi - m), mm=math.sin(math.pi - m) * m,
        easy_margin=bool(easy_margin), num_classes=C, c_tile=c_tile,
        needs_mask=(C % c_tile != 0))

    cosine, loss_rows = pl.pallas_call(
        kernel,
        out_shape=(
            jax.ShapeDtypeStruct((B, C), jnp.float32),   # cosine (ragged blocks OK)
            jax.ShapeDtypeStruct((B, 1), jnp.float32),   # per-row CE loss
        ),
        grid_spec=pltpu.PrefetchScalarGridSpec(
            num_scalar_prefetch=0,
            grid=(num_b, num_c),
            in_specs=[
                pl.BlockSpec((b_tile, 1), lambda b, c: (b, 0)),      # label (resident)
                pl.BlockSpec((b_tile, D), lambda b, c: (b, 0)),      # x (resident)
                pl.BlockSpec((c_tile, D), lambda b, c: (c, 0)),      # weight (streamed)
                pl.BlockSpec((1, c_tile), lambda b, c: (0, c)),      # 1/||w|| (streamed)
            ],
            out_specs=(
                pl.BlockSpec((b_tile, c_tile), lambda b, c: (b, c)),  # cosine tile
                pl.BlockSpec((b_tile, 1), lambda b, c: (b, 0)),       # loss rows
            ),
            scratch_shapes=[pltpu.VMEM((b_tile, 1), jnp.float32)] * 3,
        ),
        compiler_params=pltpu.CompilerParams(
            dimension_semantics=("parallel", "arbitrary"),
            vmem_limit_bytes=48 * 2**20),
    )(label_arr, x_c, w_c, inv_norm)

    if label is None:
        return cosine
    loss = jnp.mean(loss_rows[:, 0])
    return loss, cosine


def _reference(x, weight, label, s, m, easy_margin, compute_dtype):
    """Pure-JAX reference matching the kernel's bf16-matmul / f32-rest numerics."""
    C = weight.shape[0]
    nrm = jnp.sqrt(jnp.sum(weight.astype(jnp.float32) ** 2, axis=1))
    inv = 1.0 / jnp.maximum(nrm, 1e-12)
    dot = jnp.dot(x.astype(compute_dtype), weight.astype(compute_dtype).T,
                  preferred_element_type=jnp.float32)
    cos = dot * inv[None, :]
    sine = jnp.sqrt(jnp.clip(1.0 - cos * cos, 0.0, 1.0))
    phi = cos * math.cos(m) - sine * math.sin(m)
    if easy_margin:
        phi = jnp.where(cos > 0.0, phi, cos)
    else:
        phi = jnp.where(cos > math.cos(math.pi - m), phi,
                        cos - math.sin(math.pi - m) * m)
    one_hot = jax.nn.one_hot(label, C, dtype=jnp.float32)
    out = (one_hot * phi + (1.0 - one_hot) * cos) * s
    lse = jax.scipy.special.logsumexp(out, axis=1)
    tgt = jnp.take_along_axis(out, label[:, None], axis=1)[:, 0]
    return jnp.mean(lse - tgt), cos


if __name__ == "__main__":
    # Small shapes consistent with the module (in_features / num_classes scaled down).
    B, IN_FEATURES, NUM_CLASSES = 8, 128, 256
    S, M = 10.0, 0.5

    key = jax.random.PRNGKey(0)
    kx, kw, kl = jax.random.split(key, 3)

    # Deterministic xavier_uniform_-style init for weight (out_features, in_features).
    bound = math.sqrt(6.0 / (NUM_CLASSES + IN_FEATURES))
    weight = jax.random.uniform(kw, (NUM_CLASSES, IN_FEATURES), jnp.float32,
                                -bound, bound)

    # ArcFace feeds L2-normalized embeddings (caller side, as in the original
    # pipeline), keeping cosine in [-1, 1] so the margin thresholds are meaningful.
    x = jax.random.normal(kx, (B, IN_FEATURES), jnp.float32)
    x = x / jnp.maximum(jnp.linalg.norm(x, axis=1, keepdims=True), 1e-12)
    label = jax.random.randint(kl, (B,), 0, NUM_CLASSES, dtype=jnp.int32)

    # c_tile=128 -> 2 class tiles, exercising the online-logsumexp accumulation.
    loss, cosine = arc_margin_forward(x, weight, label, s=S, m=M,
                                      easy_margin=False, c_tile=128)
    jax.block_until_ready((loss, cosine))

    loss_ref, cos_ref = _reference(x, weight, label, S, M, False, jnp.bfloat16)
    assert cosine.shape == (B, NUM_CLASSES)
    assert jnp.isfinite(loss), float(loss)
    assert jnp.allclose(cosine, cos_ref, atol=2e-3, rtol=2e-3), \
        float(jnp.max(jnp.abs(cosine - cos_ref)))
    assert jnp.allclose(loss, loss_ref, atol=2e-3, rtol=2e-3), \
        (float(loss), float(loss_ref))

    # Ragged shapes: C not divisible by the class tile, B not a multiple of 8.
    B2, C2 = 6, 200
    w2 = jax.random.uniform(kw, (C2, IN_FEATURES), jnp.float32, -bound, bound)
    x2 = jax.random.normal(kx, (B2, IN_FEATURES), jnp.float32)
    x2 = x2 / jnp.maximum(jnp.linalg.norm(x2, axis=1, keepdims=True), 1e-12)
    lab2 = jax.random.randint(kl, (B2,), 0, C2, dtype=jnp.int32)
    loss2, cos2 = arc_margin_forward(x2, w2, lab2, s=S, m=M,
                                     easy_margin=False, c_tile=128)
    jax.block_until_ready((loss2, cos2))
    loss2_ref, cos2_ref = _reference(x2, w2, lab2, S, M, False, jnp.bfloat16)
    assert cos2.shape == (B2, C2)
    assert jnp.allclose(cos2, cos2_ref, atol=2e-3, rtol=2e-3), \
        float(jnp.max(jnp.abs(cos2 - cos2_ref)))
    assert jnp.allclose(loss2, loss2_ref, atol=2e-3, rtol=2e-3), \
        (float(loss2), float(loss2_ref))

    # Inference path: label=None returns just the cosine.
    cos_only = arc_margin_forward(x, weight, None, s=S, m=M, c_tile=128)
    jax.block_until_ready(cos_only)
    assert jnp.allclose(cos_only, cos_ref, atol=2e-3, rtol=2e-3)

    print("KERNEL_OK")
</pallas_src>

<mosaic_0001>
module attributes {stable_mosaic.version = 11 : i64} {
  func.func @_arc_margin_kernel(%arg0: i32, %arg1: i32, %arg2: memref<8x1xi32, #tpu.memory_space<vmem>>, %arg3: memref<8x128xbf16, #tpu.memory_space<vmem>>, %arg4: memref<128x128xbf16, #tpu.memory_space<vmem>>, %arg5: memref<1x128xf32, #tpu.memory_space<vmem>>, %arg6: memref<8x128xf32, #tpu.memory_space<vmem>>, %arg7: memref<8x1xf32, #tpu.memory_space<vmem>>, %arg8: memref<8x1xf32, #tpu.memory_space<vmem>>, %arg9: memref<8x1xf32, #tpu.memory_space<vmem>>, %arg10: memref<8x1xf32, #tpu.memory_space<vmem>>) attributes {dimension_semantics = [#tpu.dimension_semantics<parallel>, #tpu.dimension_semantics<arbitrary>], iteration_bounds = array<i64: 1, 2>, scalar_prefetch = 0 : i64, scratch_operands = 3 : i64, tpu.core_type = #tpu.core_type<tc>, window_params = [{transform_indices = @transform_0, window_bounds = array<i64: 8, 1>}, {transform_indices = @transform_1, window_bounds = array<i64: 8, 128>}, {transform_indices = @transform_2, window_bounds = array<i64: 128, 128>}, {transform_indices = @transform_3, window_bounds = array<i64: 1, 128>}, {transform_indices = @transform_4, window_bounds = array<i64: 8, 128>}, {transform_indices = @transform_5, window_bounds = array<i64: 8, 1>}]} {
    %c0_i32 = arith.constant 0 : i32
    %0 = arith.cmpi eq, %arg1, %c0_i32 : i32
    %1 = arith.extui %0 : i1 to i32
    %c0_i32_0 = arith.constant 0 : i32
    %2 = arith.cmpi ne, %1, %c0_i32_0 : i32
    scf.if %2 {
      %cst_28 = arith.constant -1.000000e+30 : f32
      %45 = vector.broadcast %cst_28 : f32 to vector<8x1xf32>
      %c0_29 = arith.constant 0 : index
      %c0_30 = arith.constant 0 : index
      %46 = vector.load %arg8[%c0_29, %c0_30] : memref<8x1xf32, #tpu.memory_space<vmem>>, vector<8x1xf32>
      tpu.vector_store %arg8[%c0_29, %c0_30], %45 {strides = array<i32>} : memref<8x1xf32, #tpu.memory_space<vmem>>, vector<8x1xf32>,
      %cst_31 = arith.constant 0.000000e+00 : f32
      %47 = vector.broadcast %cst_31 : f32 to vector<8x1xf32>
      %c0_32 = arith.constant 0 : index
      %c0_33 = arith.constant 0 : index
      %48 = vector.load %arg9[%c0_32, %c0_33] : memref<8x1xf32, #tpu.memory_space<vmem>>, vector<8x1xf32>
      tpu.vector_store %arg9[%c0_32, %c0_33], %47 {strides = array<i32>} : memref<8x1xf32, #tpu.memory_space<vmem>>, vector<8x1xf32>,
      %cst_34 = arith.constant 0.000000e+00 : f32
      %49 = vector.broadcast %cst_34 : f32 to vector<8x1xf32>
      %c0_35 = arith.constant 0 : index
      %c0_36 = arith.constant 0 : index
      %50 = vector.load %arg10[%c0_35, %c0_36] : memref<8x1xf32, #tpu.memory_space<vmem>>, vector<8x1xf32>
      tpu.vector_store %arg10[%c0_35, %c0_36], %49 {strides = array<i32>} : memref<8x1xf32, #tpu.memory_space<vmem>>, vector<8x1xf32>,
    } else {
    }
    %c0 = arith.constant 0 : index
    %c0_1 = arith.constant 0 : index
    %3 = vector.load %arg3[%c0, %c0_1] : memref<8x128xbf16, #tpu.memory_space<vmem>>, vector<8x128xbf16>
    %c0_2 = arith.constant 0 : index
    %c0_3 = arith.constant 0 : index
    %4 = vector.load %arg4[%c0_2, %c0_3] : memref<128x128xbf16, #tpu.memory_space<vmem>>, vector<128x128xbf16>
    %cst = arith.constant dense<0.000000e+00> : vector<8x128xf32>
    %5 = tpu.matmul %3, %4, %cst {dimension_numbers = #tpu.dot_dimension_numbers<[1], [1], [0], [0], [0, 0, 1, 0], [], []>} : vector<8x128xbf16>, vector<128x128xbf16>, vector<8x128xf32> -> vector<8x128xf32>
    %c0_4 = arith.constant 0 : index
    %c0_5 = arith.constant 0 : index
    %6 = vector.load %arg5[%c0_4, %c0_5] : memref<1x128xf32, #tpu.memory_space<vmem>>, vector<1x128xf32>
    %7 = vector.broadcast %6 : vector<1x128xf32> to vector<8x128xf32>
    %8 = arith.mulf %5, %7 : vector<8x128xf32>
    %c0_6 = arith.constant 0 : index
    %c0_7 = arith.constant 0 : index
    %9 = vector.load %arg6[%c0_6, %c0_7] : memref<8x128xf32, #tpu.memory_space<vmem>>, vector<8x128xf32>
    tpu.vector_store %arg6[%c0_6, %c0_7], %8 {strides = array<i32>} : memref<8x128xf32, #tpu.memory_space<vmem>>, vector<8x128xf32>,
    %c0_8 = arith.constant 0 : index
    %c0_9 = arith.constant 0 : index
    %10 = vector.load %arg2[%c0_8, %c0_9] : memref<8x1xi32, #tpu.memory_space<vmem>>, vector<8x1xi32>
    %11 = tpu.iota {dimensions = array<i32: 1>} : vector<8x128xi32>
    %c128_i32 = arith.constant 128 : i32
    %12 = arith.muli %arg1, %c128_i32 : i32
    %13 = vector.broadcast %12 : i32 to vector<8x128xi32>
    %14 = arith.addi %11, %13 : vector<8x128xi32>
    %15 = vector.broadcast %10 : vector<8x1xi32> to vector<8x128xi32>
    %16 = arith.cmpi eq, %14, %15 : vector<8x128xi32>
    %c0_10 = arith.constant 0 : index
    %c0_11 = arith.constant 0 : index
    %17 = vector.load %arg10[%c0_10, %c0_11] : memref<8x1xf32, #tpu.memory_space<vmem>>, vector<8x1xf32>
    %cst_12 = arith.constant 0.000000e+00 : f32
    %18 = vector.broadcast %cst_12 : f32 to vector<8x128xf32>
    %19 = arith.select %16, %8, %18 : vector<8x128xi1>, vector<8x128xf32>
    %cst_13 = arith.constant dense<0.000000e+00> : vector<8xf32>
    %20 = vector.multi_reduction <add>, %19, %cst_13 [1] : vector<8x128xf32> to vector<8xf32>
    %21 = vector.shape_cast %20 : vector<8xf32> to vector<8x1xf32>
    %22 = arith.addf %17, %21 : vector<8x1xf32>
    %c0_14 = arith.constant 0 : index
    %c0_15 = arith.constant 0 : index
    %23 = vector.load %arg10[%c0_14, %c0_15] : memref<8x1xf32, #tpu.memory_space<vmem>>, vector<8x1xf32>
    tpu.vector_store %arg10[%c0_14, %c0_15], %22 {strides = array<i32>} : memref<8x1xf32, #tpu.memory_space<vmem>>, vector<8x1xf32>,
    %cst_16 = arith.constant 1.000000e+01 : f32
    %24 = vector.broadcast %cst_16 : f32 to vector<8x128xf32>
    %25 = arith.mulf %8, %24 : vector<8x128xf32>
    %c0_17 = arith.constant 0 : index
    %c0_18 = arith.constant 0 : index
    %26 = vector.load %arg8[%c0_17, %c0_18] : memref<8x1xf32, #tpu.memory_space<vmem>>, vector<8x1xf32>
    %cst_19 = arith.constant dense<0xFF800000> : vector<8xf32>
    %27 = vector.multi_reduction <maximumf>, %25, %cst_19 [1] : vector<8x128xf32> to vector<8xf32>
    %28 = vector.shape_cast %27 : vector<8xf32> to vector<8x1xf32>
    %29 = arith.maximumf %26, %28 : vector<8x1xf32>
    %c0_20 = arith.constant 0 : index
    %c0_21 = arith.constant 0 : index
    %30 = vector.load %arg9[%c0_20, %c0_21] : memref<8x1xf32, #tpu.memory_space<vmem>>, vector<8x1xf32>
    %31 = arith.subf %26, %29 : vector<8x1xf32>
    %32 = math.exp %31 : vector<8x1xf32>
    %33 = arith.mulf %30, %32 : vector<8x1xf32>
    %34 = vector.broadcast %29 : vector<8x1xf32> to vector<8x128xf32>
    %35 = arith.subf %25, %34 : vector<8x128xf32>
    %36 = math.exp %35 : vector<8x128xf32>
    %cst_22 = arith.constant dense<0.000000e+00> : vector<8xf32>
    %37 = vector.multi_reduction <add>, %36, %cst_22 [1] : vector<8x128xf32> to vector<8xf32>
    %38 = vector.shape_cast %37 : vector<8xf32> to vector<8x1xf32>
    %39 = arith.addf %33, %38 : vector<8x1xf32>
    %c0_23 = arith.constant 0 : index
    %c0_24 = arith.constant 0 : index
    %40 = vector.load %arg9[%c0_23, %c0_24] : memref<8x1xf32, #tpu.memory_space<vmem>>, vector<8x1xf32>
    tpu.vector_store %arg9[%c0_23, %c0_24], %39 {strides = array<i32>} : memref<8x1xf32, #tpu.memory_space<vmem>>, vector<8x1xf32>,
    %c0_25 = arith.constant 0 : index
    %c0_26 = arith.constant 0 : index
    %41 = vector.load %arg8[%c0_25, %c0_26] : memref<8x1xf32, #tpu.memory_space<vmem>>, vector<8x1xf32>
    tpu.vector_store %arg8[%c0_25, %c0_26], %29 {strides = array<i32>} : memref<8x1xf32, #tpu.memory_space<vmem>>, vector<8x1xf32>,
    %c1_i32 = arith.constant 1 : i32
    %42 = arith.cmpi eq, %arg1, %c1_i32 : i32
    %43 = arith.extui %42 : i1 to i32
    %c0_i32_27 = arith.constant 0 : i32
    %44 = arith.cmpi ne, %43, %c0_i32_27 : i32
    scf.if %44 {
      %c0_28 = arith.constant 0 : index
      %c0_29 = arith.constant 0 : index
      %45 = vector.load %arg10[%c0_28, %c0_29] : memref<8x1xf32, #tpu.memory_space<vmem>>, vector<8x1xf32>
      %46 = arith.mulf %45, %45 : vector<8x1xf32>
      %cst_30 = arith.constant 1.000000e+00 : f32
      %47 = vector.broadcast %cst_30 : f32 to vector<8x1xf32>
      %48 = arith.subf %47, %46 : vector<8x1xf32>
      %cst_31 = arith.constant 0.000000e+00 : f32
      %cst_32 = arith.constant 1.000000e+00 : f32
      %49 = vector.broadcast %cst_31 : f32 to vector<8x1xf32>
      %50 = arith.maximumf %49, %48 : vector<8x1xf32>
      %51 = vector.broadcast %cst_32 : f32 to vector<8x1xf32>
      %52 = arith.minimumf %51, %50 : vector<8x1xf32>
      %53 = math.sqrt %52 : vector<8x1xf32>
      %cst_33 = arith.constant 0.87758255 : f32
      %54 = vector.broadcast %cst_33 : f32 to vector<8x1xf32>
      %55 = arith.mulf %45, %54 : vector<8x1xf32>
      %cst_34 = arith.constant 0.47942555 : f32
      %56 = vector.broadcast %cst_34 : f32 to vector<8x1xf32>
      %57 = arith.mulf %53, %56 : vector<8x1xf32>
      %58 = arith.subf %55, %57 : vector<8x1xf32>
      %cst_35 = arith.constant -0.87758255 : f32
      %59 = vector.broadcast %cst_35 : f32 to vector<8x1xf32>
      %60 = arith.cmpf ogt, %45, %59 : vector<8x1xf32>
      %cst_36 = arith.constant 0.239712775 : f32
      %61 = vector.broadcast %cst_36 : f32 to vector<8x1xf32>
      %62 = arith.subf %45, %61 : vector<8x1xf32>
      %63 = arith.select %60, %58, %62 : vector<8x1xi1>, vector<8x1xf32>
      %c0_37 = arith.constant 0 : index
      %c0_38 = arith.constant 0 : index
      %64 = vector.load %arg8[%c0_37, %c0_38] : memref<8x1xf32, #tpu.memory_space<vmem>>, vector<8x1xf32>
      %c0_39 = arith.constant 0 : index
      %c0_40 = arith.constant 0 : index
      %65 = vector.load %arg9[%c0_39, %c0_40] : memref<8x1xf32, #tpu.memory_space<vmem>>, vector<8x1xf32>
      %cst_41 = arith.constant 1.000000e+01 : f32
      %66 = vector.broadcast %cst_41 : f32 to vector<8x1xf32>
      %67 = arith.mulf %66, %63 : vector<8x1xf32>
      %68 = arith.subf %67, %64 : vector<8x1xf32>
      %69 = math.exp %68 : vector<8x1xf32>
      %70 = arith.addf %65, %69 : vector<8x1xf32>
      %cst_42 = arith.constant 1.000000e+01 : f32
      %71 = vector.broadcast %cst_42 : f32 to vector<8x1xf32>
      %72 = arith.mulf %71, %45 : vector<8x1xf32>
      %73 = arith.subf %72, %64 : vector<8x1xf32>
      %74 = math.exp %73 : vector<8x1xf32>
      %75 = arith.subf %70, %74 : vector<8x1xf32>
      %cst_43 = arith.constant 1.000000e-30 : f32
      %76 = vector.broadcast %cst_43 : f32 to vector<8x1xf32>
      %77 = arith.maximumf %75, %76 : vector<8x1xf32>
      %78 = math.log %77 : vector<8x1xf32>
      %79 = arith.addf %64, %78 : vector<8x1xf32>
      %cst_44 = arith.constant 1.000000e+01 : f32
      %80 = vector.broadcast %cst_44 : f32 to vector<8x1xf32>
      %81 = arith.mulf %80, %63 : vector<8x1xf32>
      %82 = arith.subf %79, %81 : vector<8x1xf32>
      %c0_45 = arith.constant 0 : index
      %c0_46 = arith.constant 0 : index
      %83 = vector.load %arg7[%c0_45, %c0_46] : memref<8x1xf32, #tpu.memory_space<vmem>>, vector<8x1xf32>
      tpu.vector_store %arg7[%c0_45, %c0_46], %82 {strides = array<i32>} : memref<8x1xf32, #tpu.memory_space<vmem>>, vector<8x1xf32>,
    } else {
    }
    return
  }
  func.func @transform_0(%arg0: i32, %arg1: i32) -> (i32, i32) {
    %c0_i32 = arith.constant 0 : i32
    %c0_i32_0 = arith.constant 0 : i32
    return %arg0, %c0_i32 : i32, i32
  }
  func.func @transform_1(%arg0: i32, %arg1: i32) -> (i32, i32) {
    %c0_i32 = arith.constant 0 : i32
    %c0_i32_0 = arith.constant 0 : i32
    return %arg0, %c0_i32 : i32, i32
  }
  func.func @transform_2(%arg0: i32, %arg1: i32) -> (i32, i32) {
    %c0_i32 = arith.constant 0 : i32
    %c0_i32_0 = arith.constant 0 : i32
    return %arg1, %c0_i32 : i32, i32
  }
  func.func @transform_3(%arg0: i32, %arg1: i32) -> (i32, i32) {
    %c0_i32 = arith.constant 0 : i32
    %c0_i32_0 = arith.constant 0 : i32
    return %c0_i32, %arg1 : i32, i32
  }
  func.func @transform_4(%arg0: i32, %arg1: i32) -> (i32, i32) {
    %c0_i32 = arith.constant 0 : i32
    return %arg0, %arg1 : i32, i32
  }
  func.func @transform_5(%arg0: i32, %arg1: i32) -> (i32, i32) {
    %c0_i32 = arith.constant 0 : i32
    %c0_i32_0 = arith.constant 0 : i32
    return %arg0, %c0_i32 : i32, i32
  }
}

</mosaic_0001>

<bundles_post_ra>
// kernel: tpu_custom_call.1
= control target key start
LH: loop header
LB: loop body
LE: loop exit
PB: predicated region body
PF: predicated region fallthrough
CT: control target
= control target key end

     0   :  { %11 = vsyncpa [#allocation6], 0  ;;  %s1201_s0 = inlined_call_operand.vmem [shape: s32[8,1], index: 0, kind: input, shape index: {}]   ;;  %s1202_s1 = inlined_call_operand.vmem [shape: bf16[8,128], index: 1, kind: input, shape index: {}]   ;;  %s1203_s2 = inlined_call_operand.hbm [shape: bf16[256,128], index: 2, kind: input, shape index: {}]   ;;  %s1204_s3 = inlined_call_operand.vmem [shape: f32[1,256], index: 3, kind: input, shape index: {}]   ;;  %s1205_s4 = inlined_call_operand.hbm [shape: f32[8,256], index: 4, kind: output, shape index: {0}]   ;;  %s1206_s5 = inlined_call_operand.vmem [shape: f32[8,1], index: 5, kind: output, shape index: {1}]  }
   0x1   :  { %13 = vsyncpa [#allocation6 + $0x1], 0 }
   0x2   :  { %14 = vsyncpa [#allocation7], 0 }
   0x3   :  { %16 = vsyncpa [#allocation7 + $0x1], 0  ;;  %s987_s18 = smov 0   ;;  %s989_s19 = smov 0  }
   0x4   :  { %s991_s20 = smov 0   ;;  %s993_s21 = smov 0  }
   0x5   :  { %s995_s22 = smov 0   ;;  %s997_s23 = smov 0  }
   0x6 LB: > { %s683_s24 = sadd.s32 4294967295, %s946_s23   ;;  %s684_s25 = sadd.s32 4294967294, %s946_s23   ;;  %s946_s23 = sphi %s997_s23, %s22_s23   ;;  %s942_s22 = sphi %s995_s22, %s1221_s22   ;;  %s938_s21 = sphi %s993_s21, %s1220_s21   ;;  %s934_s20 = sphi %s991_s20, %s1219_s20   ;;  %s930_s19 = sphi %s989_s19, %s1218_s19   ;;  %s926_s18 = sphi %s987_s18, %s1217_s18  }
   0x7   : > { %s31_s26 = sadd.s32 1, %s942_s22  ;;  %s93_s27 = sadd.s32 1, %s934_s20 }
   0x8   : > { %p32_p0 = scmp.ge.s32.totalorder %s31_s26, 2  ;;  %p100_p1 = scmp.ne.s32.totalorder %s934_s20, %s930_s19 }
   0x9   : > { %p101_p2 = scmp.eq.s32.totalorder %s946_s23, 0  ;;  %p106_p3 = scmp.ne.s32.totalorder %s930_s19, %s926_s18 }
   0xa   : > { %s1223_s26 = smov (%p32_p0, %s31_s26), 0  ;;  %p107_p5 = scmp.eq.s32.totalorder %s683_s24, 0 }
   0xb   : > { %p1028_p4 = por %p101_p2, %p100_p1  ;;  %s90_s29 = ssub.s32 %s942_s22, %s1223_s26 }
   0xc   : > { %p158_p6 = scmp.eq.s32.totalorder %s683_s24, 1  ;;  %p91_p7 = scmp.eq.s32.totalorder %s90_s29, 0 }
   0xd   : > { %p1034_p8 = por %p107_p5, %p106_p3  ;;  %p164_p10 = scmp.eq.s32.totalorder %s684_s25, 1 }
   0xe   : > { %p1038_p9 = por %p158_p6, %p100_p1  ;;  %p755_p13 = scmp.lt.s32.totalorder %s946_s23, 2 }
   0xf   : > { %s1043_s7 = scalar_select %p91_p7, %s934_s20, %s93_s27  }
  0x10   : > { %s1210_s6 = scalar_select %p1038_p9, 1, 0 }
  0x11   : > { %p1045_p11 = por %p164_p10, %p106_p3  ;;  %s224_s9 = sand.u32 1, %s934_s20  }
  0x12   : > { %s689_s10 = sshll.u32 %s224_s9, 6  ;;  %s713_s11 = sshll.u32 %s942_s22, 10 }
  0x13   : > { %s1211_s8 = scalar_select %p1045_p11, 1, 0 }
  0x14   : > { %s1056_s14 = scalar_lea.hbm %s1203_s2, %s713_s11  ;;  %s228_s15 = scalar_lea.vmem [#allocation5], %s689_s10 }
  0x15   : > { %s235_s16 = sshll.u32 %s228_s15, 4  ;;  %p1062_p0 = pnand %p755_p13, %p1028_p4  ;;  %s1058_s16 = int_to_ptr.vmem [resolvable:$true] %s235_s16 }
  0x16   : > { %s1067_s24 = scalar_lea.sflag [#allocation6], %s224_s9  ;;  %s834_s25 = scalar_lea.hbm %s1056_s14, 1024 }
  0x17   : > { %p835_p2 = scmp.ne.s32.totalorder %s1056_s14, %s834_s25  ;;  %p836_p3 = pneg %p1062_p0 }
  0x18   : > { %s839_s28 = scalar_lea.hbm %s1203_s2, 2048  ;;  %p840_p4 = scmp.lt.u32.totalorder %s1056_s14, %s1203_s2 }
  0x19   : > { %p837_p5 = pnand %p836_p3, %p835_p2  ;;  %p841_p7 = scmp.lt.u32.totalorder %s839_s28, %s834_s25 }
  0x1a   : > { %p843_p13 = scmp.lt.u32.totalorder %s834_s25, %s1056_s14 }
  0x1b   : > { %p838_p6 = pneg %p837_p5  ;;  %p842_p10 = por %p841_p7, %p840_p4 }
  0x1d   : > { %p844_p12 = por %p843_p13, %p842_p10 }
  0x1f   : > { %p845_p1 = pnand %p844_p12, %p838_p6 }
  0x21   : > { %848 = shalt.err (!%p845_p1)
}
  0x22   : > { %s849_s9 = scalar_lea.vmem %s1058_s16, 1024  ;;  %s948_s12 = smov [#allocation5]  }
  0x23   : > { %p850_p2 = scmp.ne.s32.totalorder %s1058_s16, %s849_s9  ;;  %s854_s13 = sshll.u32 %s948_s12, 4  ;;  %s855_s13 = int_to_ptr.vmem [resolvable:$false] %s854_s13 }
  0x24   : > { %s856_s15 = scalar_lea.vmem %s855_s13, 2048  ;;  %p857_p9 = scmp.lt.s32.totalorder %s1058_s16, %s855_s13 }
  0x25   : > { %p852_p5 = pnand %p850_p2, %p836_p3  ;;  %p858_p4 = scmp.lt.s32.totalorder %s856_s15, %s849_s9 }
  0x27   : > { %p853_p11 = pneg %p852_p5  ;;  %p859_p7 = por %p858_p4, %p857_p9 }
  0x29   : > { %p860_p10 = pnand %p859_p7, %p853_p11 }
  0x2b   : > { %863 = shalt.err (!%p860_p10)
}
  0x2c   : > { %s949_s25 = smov 64   ;;  %s950_s27 = smov 4  }
  0x2d   : > { %750 = dma.hbm_to_vmem [thread:$0]  (!%p1062_p0), %s1056_s14, 1024, %s1058_s16, %s1067_s24, %s949_s25, %s949_s25, %s950_s27  }
  0x2e   : > { %p249_p12 = scmp.lt.s32.totalorder %s946_s23, 3  ;;  %p1213_p1 = scmp.ge.s32.totalorder %s946_s23, 1 }
  0x30   : > { %p250_p3 = pnand %p1213_p1, %p249_p12 }
  0x31   : > { %s1099_s29 = sand.u32 (!%p250_p3), 1, %s930_s19  }
  0x32   : > { %253 = sbr.rel (%p250_p3) target bundleno = 837 (0x345), region = 36  ;;  %s693_s28 = sshll.u32 (!%p250_p3), %s1099_s29, 6 }
  0x33   : > { %s256_s10 = scalar_lea.sflag (!%p250_p3), [#allocation6], %s1099_s29  ;;  %s1103_s11 = scalar_lea.vmem (!%p250_p3), [#allocation5], %s693_s28 }
  0x39   : > { %917 = dma.done.wait (%p1034_p8), %s256_s10, 1024  }
  0x3a   : > { %919 = vsyncadd (%p1034_p8), %s256_s10, 4294966272  ;;  %s694_s14 = sshll.u32 %s1099_s29, 3  ;;  %p310_p9 = scmp.lt.s32.totalorder %s938_s21, 1 }
  0x3b   : > { %s1118_s12 = scalar_lea.vmem [#allocation8], %s694_s14  ;;  %p695_p11 = scmp.ne.s32.totalorder %s938_s21, 0 }
  0x3c   : > { %s1112_s16 = scalar_select %p310_p9, %s938_s21, 1 }
  0x3d   : > { %321 = sbr.rel (%p695_p11) target bundleno = 68 (0x44), region = 44  ;;  %vm322_vm0 = vcmask (!%p695_p11), 7168   ;;  %v951_v0 = vmov (!%p695_p11), -1e+30   ;;  %v952_v1 = vmov (!%p695_p11), 0.0  }
  0x3e   : > { %s312_s9 = scalar_lea.vmem %s1204_s3, %s1112_s16  ;;  %323 = vst.msk [vmem:[#allocation2] sm:$0xff] (!%p695_p11), %vm322_vm0, %v951_v0  ;;  %324 = vst.msk [vmem:[#allocation3] sm:$0xff] (!%p695_p11), %vm322_vm0, %v952_v1 }
  0x3f   : > { %325 = vst.msk [vmem:[#allocation4] sm:$0xff] (!%p695_p11), %vm322_vm0, %v952_v1 }
  0x44 PF: > { %v814_v2 = vld [vmem:[%s1103_s11] sm:$0xff]   ;;  %v953_v3 = vmov 0.0   ;;  %vm954_vm1 = vmmov 0   ;;  %v955_v4 = vmov 0   ;;  %v815_v5 = vld [vmem:[%s1103_s11 + $0x8] sm:$0xff]   ;;  %v816_v7 = vld [vmem:[%s1103_s11 + $0x10] sm:$0xff]   ;;  %v441_v14 = vlaneseq }
  0x45   : > { %723 = vmatprep.subr.bf16.mxu0 %v953_v3  ;;  %739 = vmatprep.mubr.msk.bf16.mxu0 %vm954_vm1, %v953_v3  ;;  %v440_v6 = vld [vmem:[%s1201_s0] sm:$0xff]  ;;  %v817_v8 = vld [vmem:[%s1103_s11 + $0x18] sm:$0xff]   ;;  %v818_v9 = vld [vmem:[%s1103_s11 + $0x20] sm:$0xff]   ;;  %s705_s27 = sshll.u32 %s938_s21, 7  ;;  %vm455_vm3 = vcmask 7168   ;;  %p706_p8 = scmp.ne.s32.totalorder %s938_s21, 1 }
  0x46   : > { %724 = vmatpush3.bf16.xpose.msra.mxu0 %v814_v2  ;;  %813 = vset.pattern.permute.xlu1 %v955_v4  ;;  %v819_v10 = vld [vmem:[%s1103_s11 + $0x28] sm:$0xff]   ;;  %v820_v11 = vld [vmem:[%s1103_s11 + $0x30] sm:$0xff]   ;;  %v821_v12 = vld [vmem:[%s1103_s11 + $0x38] sm:$0xff]   ;;  %v442_v15 = vand.u32 127, %v441_v14  ;;  %v444_v16 = vstv %s705_s27 }
  0x47   : > { %725 = vmatprep.subr.bf16.mxu0 %v953_v3  ;;  %812 = vset.pattern.permute.xlu0 %v955_v4  ;;  %v326_v13 = vld [vmem:[%s1202_s1] sm:$0xf]  ;;  %v450_v27 = vld [vmem:[#allocation4] sm:$0xff]  ;;  %v462_v40 = vld [vmem:[#allocation3] sm:$0xff] }
  0x48   : > { %447 = vperm.xlu1 %813, %v440_v6   ;;  %v445_v17 = vadd.s32 %v444_v16, %v442_v15  ;;  %v704_v19 = vld [vmem:[%s312_s9] ss:$0 sm:$0xff] }
  0x49   : > { %v458_v28 = vld [vmem:[#allocation2] sm:$0xff] }
  0x4e   : > { %726 = vmatpush3.bf16.xpose.msra.mxu0 %v815_v5 }
  0x4f   : > { %727 = vmatprep.subr.bf16.mxu0 %v953_v3 }
  0x56   : > { %728 = vmatpush3.bf16.xpose.msra.mxu0 %v816_v7 }
  0x57   : > { %729 = vmatprep.subr.bf16.mxu0 %v953_v3 }
  0x5e   : > { %730 = vmatpush3.bf16.xpose.msra.mxu0 %v817_v8 }
  0x5f   : > { %731 = vmatprep.subr.bf16.mxu0 %v953_v3 }
  0x66   : > { %732 = vmatpush3.bf16.xpose.msra.mxu0 %v818_v9 }
  0x67   : > { %733 = vmatprep.subr.bf16.mxu0 %v953_v3 }
  0x6e   : > { %734 = vmatpush3.bf16.xpose.msra.mxu0 %v819_v10 }
  0x6f   : > { %735 = vmatprep.subr.bf16.mxu0 %v953_v3 }
  0x76   : > { %736 = vmatpush3.bf16.xpose.msra.mxu0 %v820_v11 }
  0x77   : > { %737 = vmatprep.subr.bf16.mxu0 %v953_v3 }
  0x7e   : > { %738 = vmatpush3.bf16.xpose.msra.mxu0 %v821_v12 }
  0x85   : > { %740 = vmatmul.mubr.bf16.vlgmr.msra.gmra.mrb[0].mxu0 %v326_v13 }
  0xc7   : > { %v448_v18 = vpop.permute.xlu1 %447 }
  0xc8   : > { %vm449_vm2 = vcmp.eq.s32.totalorder %v445_v17, %v448_v18 }
 0x158   : > { %v425_v20 = vpop.f32.mrb[0].mxu0 }
 0x159   : > { %v438_v21 = vmul.f32 %v704_v19, %v425_v20  ;;  %v741_v22 = vpop.f32.mrb[1].mxu0 }
 0x15a   : > { %v428_v23 = vpop.f32.mrb[2].mxu0 }
 0x15b   : > { %439 = vst [vmem:[%s1118_s12] sm:$0xff] %v438_v21  ;;  %v742_v24 = vpop.f32.mrb[3].mxu0  ;;  %v451_v25 = vsel %vm449_vm2, %v438_v21, 0.0  ;;  %v457_v26 = vmul.f32 10.0, %v438_v21 }
 0x15c   : > { %452 = vadd.xlane.f32.xlu1 %v451_v25 }
 0x15d   : > { %459 = vmax.xlane.f32.xlu0 %v457_v26 }
 0x1e9   : > { %v453_v29 = vpop.xlane.xlu1 %452 }
 0x1ea   : > { %v454_v30 = vadd.f32 %v453_v29, %v450_v27  ;;  %v460_v31 = vpop.xlane.xlu0 %459 }
 0x1eb   : > { %v461_v32 = vmax.f32 %v458_v28, %v460_v31 }
 0x1ec   : > { %456 = vst.msk [vmem:[#allocation4] sm:$0xff] %vm455_vm3, %v454_v30 }
 0x1ed   : > { %v463_v33 = vsub.f32 %v458_v28, %v461_v32  ;;  %479 = vst.msk [vmem:[#allocation2] sm:$0xff] %vm455_vm3, %v461_v32  ;;  %469 = vperm.xlu0 %812, %v461_v32  }
 0x1ef   : > { %v464_v38 = vmul.f32 1.442695, %v463_v33 }
 0x1f3   : > { %v484_v44 = vld [vmem:[#allocation4] sm:$0xff] (!%p706_p8) }
 0x1f4   : > { %v485_v45 = vmul.f32 (!%p706_p8), %v484_v44, %v484_v44  ;;  %v496_v53 = vmul.f32 (!%p706_p8), 0.87758255, %v484_v44  ;;  %v509_v54 = vmul.f32 (!%p706_p8), 10.0, %v484_v44  ;;  %v707_v57 = vadd.f32 (!%p706_p8), -0.23971277, %v484_v44  ;;  %v502_v58 = vld [vmem:[#allocation2] sm:$0xff] (!%p706_p8) }
 0x1f5   : > { %vm499_vm6 = vcmp.gt.f32.partialorder (!%p706_p8), %v484_v44, -0.87758255 }
 0x1f6   : > { %v486_v46 = vsub.f32 (!%p706_p8), 1.0, %v485_v45  ;;  %v510_v60 = vsub.f32 (!%p706_p8), %v509_v54, %v502_v58 }
 0x1f8   : > { %v487_v47 = vmax.f32 (!%p706_p8), %v486_v46, 0.0  ;;  %v511_v63 = vmul.f32 (!%p706_p8), 1.442695, %v510_v60 }
 0x1fa   : > { %v488_v48 = vmin.f32 (!%p706_p8), %v487_v47, 1.0 }
 0x1fc   : > { %vm491_vm4 = vcmp.eq.f32.partialorder (!%p706_p8), %v488_v48, inf  ;;  %v494_v50 = vand.u32 (!%p706_p8), 2147483648, %v488_v48  ;;  %vm493_vm5 = vcmp.eq.f32.partialorder (!%p706_p8), %v488_v48, 0.0 }
 0x26c   : > { %v470_v34 = vpop.permute.xlu0 %469 }
 0x26d   : > { %v472_v35 = vsub.f32 %v457_v26, %v470_v34 }
 0x26f   : > { %v473_v36 = vmul.f32 1.442695, %v472_v35 }
 0x271   : > { %822 = vpow2.f32 %v473_v36 }
 0x272   : > { %824 = vpow2.f32 %v464_v38 }
 0x273   : > { %826 = vrsqrt.f32 (!%p706_p8), %v488_v48 }
 0x274   : > { %828 = vpow2.f32 (!%p706_p8), %v511_v63 }
 0x27b   : > { %v823_v37 = vpop.eup %822 }
 0x27c   : > { %475 = vadd.xlane.f32.xlu1 %v823_v37  ;;  %v825_v39 = vpop.eup %824 }
 0x27d   : > { %v466_v41 = vmul.f32 %v825_v39, %v462_v40  ;;  %v827_v49 = vpop.eup (!%p706_p8), %826 }
 0x27e   : > { %v490_v51 = vmul.f32 (!%p706_p8), %v827_v49, %v488_v48  ;;  %v829_v3 = vpop.eup (!%p706_p8), %828 }
 0x280   : > { %v492_v52 = vsel (!%p706_p8), %vm491_vm4, %v488_v48, %v490_v51 }
 0x281   : > { %v495_v55 = vsel (!%p706_p8), %vm493_vm5, %v494_v50, %v492_v52 }
 0x282   : > { %v497_v56 = vmul.f32 (!%p706_p8), 0.47942555, %v495_v55 }
 0x284   : > { %v498_v59 = vsub.f32 (!%p706_p8), %v496_v53, %v497_v56 }
 0x286   : > { %v501_v61 = vsel (!%p706_p8), %vm499_vm6, %v498_v59, %v707_v57 }
 0x287   : > { %v504_v62 = vmul.f32 (!%p706_p8), 10.0, %v501_v61 }
 0x289   : > { %v505_v0 = vsub.f32 (!%p706_p8), %v504_v62, %v502_v58 }
 0x28b   : > { %v506_v1 = vmul.f32 (!%p706_p8), 1.442695, %v505_v0 }
 0x28d   : > { %830 = vpow2.f32 (!%p706_p8), %v506_v1 }
 0x297   : > { %v831_v4 = vpop.eup (!%p706_p8), %830 }
 0x306   : > { %483 = sbr.rel (%p706_p8) target bundleno = 812 (0x32c), region = 48 }
 0x309   : > { %v476_v42 = vpop.xlane.xlu1 %475 }
 0x30a   : > { %v477_v43 = vadd.f32 %v476_v42, %v466_v41 }
 0x30c   : > { %478 = vst.msk [vmem:[#allocation3] sm:$0xff] %vm455_vm3, %v477_v43 }
 0x313   : > { %v503_v2 = vld [vmem:[#allocation3] sm:$0xff] }
 0x314   : > { %v508_v5 = vadd.f32 %v831_v4, %v503_v2 }
 0x316   : > { %v513_v6 = vsub.f32 %v508_v5, %v829_v3 }
 0x318   : > { %v514_v7 = vmax.f32 %v513_v6, 1e-30 }
 0x31a   : > { %832 = vlog2.f32 %v514_v7 }
 0x324   : > { %v833_v8 = vpop.eup %832 }
 0x325   : > { %v516_v9 = vmul.f32 0.6931472, %v833_v8 }
 0x327   : > { %v517_v10 = vadd.f32 %v516_v9, %v502_v58 }
 0x329   : > { %v518_v11 = vsub.f32 %v517_v10, %v504_v62 }
 0x32b   : > { %519 = vst.msk [vmem:[%s1206_s5] sm:$0xff] %vm455_vm3, %v518_v11 }
 0x32c PF: > { %s1157_s24 = scalar_lea.hbm %s1205_s4, %s705_s27  ;;  %s540_s9 = sshll.u32 %s1118_s12, 4  ;;  %s541_s9 = int_to_ptr.vmem [resolvable:$true] %s540_s9 }
 0x32d   : > { %s521_s30 = scalar_lea.sflag [#allocation7], %s1099_s29  ;;  %s864_s13 = scalar_lea.vmem %s541_s9, 128 }
 0x32e   : > { %p865_p0 = scmp.ne.s32.totalorder %s541_s9, %s864_s13  ;;  %p1214_p6 = scmp.ne.s32.totalorder %s1210_s6, 0 }
 0x32f   : > { %s956_s15 = smov [#allocation8]  }
 0x330   : > { %p866_p13 = pnand %p865_p0, %p1214_p6  ;;  %s868_s25 = sshll.u32 %s956_s15, 4  ;;  %s869_s25 = int_to_ptr.vmem [resolvable:$false] %s868_s25 }
 0x331   : > { %s870_s21 = scalar_lea.vmem %s869_s25, 256  ;;  %p871_p5 = scmp.lt.s32.totalorder %s541_s9, %s869_s25 }
 0x332   : > { %p867_p2 = pneg %p866_p13  ;;  %p872_p4 = scmp.lt.s32.totalorder %s870_s21, %s864_s13 }
 0x334   : > { %p873_p7 = por %p872_p4, %p871_p5 }
 0x336   : > { %p874_p10 = pnand %p873_p7, %p867_p2 }
 0x338   : > { %877 = shalt.err (!%p874_p10)
}
 0x339   : > { %s878_s29 = scalar_lea.hbm %s1157_s24, 128  ;;  %s882_s28 = scalar_lea.hbm %s1205_s4, 256 }
 0x33a   : > { %p879_p12 = scmp.ne.s32.totalorder %s1157_s24, %s878_s29  ;;  %p883_p9 = scmp.lt.u32.totalorder %s1157_s24, %s1205_s4 }
 0x33b   : > { %p884_p11 = scmp.lt.u32.totalorder %s882_s28, %s878_s29  ;;  %p886_p0 = scmp.lt.u32.totalorder %s878_s29, %s1157_s24 }
 0x33c   : > { %p880_p1 = pnand %p879_p12, %p1214_p6 }
 0x33d   : > { %p885_p8 = por %p884_p11, %p883_p9 }
 0x33e   : > { %p881_p3 = pneg %p880_p1 }
 0x33f   : > { %p887_p13 = por %p886_p0, %p885_p8 }
 0x341   : > { %p888_p2 = pnand %p887_p13, %p881_p3 }
 0x343   : > { %891 = shalt.err (!%p888_p2)
}
 0x344   : > { %745 = dma.vmem_to_hbm [thread:$0]  (%p1214_p6), %s541_s9, 128, %s1157_s24, %s521_s30  }
 0x345 PF: > { %s562_s14 = sand.u32 1, %s926_s18   ;;  %p1215_p5 = scmp.ne.s32.totalorder %s1211_s8, 0 }
 0x346   : > { %p1216_p4 = scmp.ge.s32.totalorder %s946_s23, 2  ;;  %s563_s16 = scalar_lea.sflag [#allocation7], %s562_s14 }
 0x348   : > { %p752_p7 = pnand %p1216_p4, %p1215_p5 }
 0x34a   : > { %921 = dma.done.wait (!%p752_p7), %s563_s16, 128  }
 0x34b   : > { %923 = vsyncadd (!%p752_p7), %s563_s16, 4294967168  ;;  %s22_s23 = sadd.s32 1, %s946_s23   ;;  %s1217_s18 = smov %s930_s19 }
 0x34c   : > { %p19_p10 = scmp.ge.s32.totalorder %s22_s23, 4   ;;  %s1218_s19 = smov %s934_s20 }
 0x34d   : > { %s1219_s20 = smov %s1043_s7  ;;  %s1220_s21 = smov %s942_s22 }
 0x34e   : > { %s1221_s22 = smov %s1223_s26  ;;  %21 = sbr.rel (!%p19_p10) target bundleno = 6 (0x6), region = 110 }
 0x355   :  { %568 = vsyncpa [#allocation6], 1 }
 0x356   :  { %570 = vsyncpa [#allocation6 + $0x1], 1 }
 0x357   :  { %571 = vsyncpa [#allocation7], 1 }
 0x358   :  { %573 = vsyncpa [#allocation7 + $0x1], 1 }

</bundles_post_ra>
